<compile_context>
chip_gen: v7x
topology: tpu7x:2x2x1
jax: 0.10.0
libtpu: 0.0.40
codegen_flags: <defaults>
</compile_context>

<pallas_src>
import jax
import jax.numpy as jnp
from jax.experimental import pallas as pl
from jax.experimental.pallas import tpu as pltpu


def _round_up(x, m):
    return ((x + m - 1) // m) * m


def distmult_kernel(h_ref, ew_ref, out_ref):
    # h_ref:   (B, D)   resident DistMult interaction (e1_emb * rel_emb), bf16
    # ew_ref:  (TN, D)  streamed tile of the entity-embedding table, bf16
    # out_ref: (B, TN)  tile of prediction scores
    # Contract D-with-D (no .T / XLU transpose); f32 MXU accumulation.
    # TODO(synk): at large B on v7x, re-check whether MXU operand streaming
    # binds and consider making h the stationary (weight-side) operand.
    scores = jax.lax.dot_general(
        h_ref[...], ew_ref[...],
        dimension_numbers=(((1,), (1,)), ((), ())),
        preferred_element_type=jnp.float32)
    out_ref[...] = jax.nn.sigmoid(scores).astype(out_ref.dtype)  # torch.sigmoid


def prepare_entity_table(emb_e_weight, *, tn=8192, stream_dtype=jnp.bfloat16):
    """Cast + pad the entity table ONCE (model init), not per scoring call.

    Returns (ew_padded, tn_eff): ew_padded is (n_pad, D) in `stream_dtype`
    with n_pad a multiple of tn_eff; padded rows are zero (they would score
    sigmoid(0)=0.5 and are sliced off by distmult_forward).
    """
    N, D = emb_e_weight.shape
    tn_eff = min(tn, _round_up(N, 256))      # multiple of 256: MXU-friendly
    n_pad = _round_up(N, tn_eff)             # tail pad <= tn_eff - 1 columns
    ew = emb_e_weight.astype(stream_dtype)
    if n_pad != N:
        ew = jnp.pad(ew, ((0, n_pad - N), (0, 0)))
    return ew, tn_eff


_ENTITY_AXIS_SEM = None  # cached: CORE_PARALLEL if the backend accepts it


def distmult_forward(e1_emb, rel_emb, ew_padded, num_entities, tn_eff,
                     *, out_dtype=jnp.float32):
    """e1_emb, rel_emb: (B, D) f32; ew_padded/tn_eff from prepare_entity_table.

    Returns (B, num_entities) scores in `out_dtype`.  Pass out_dtype=bf16 when
    B is large and the consumer tolerates it (halves score writeback traffic).
    """
    global _ENTITY_AXIS_SEM
    B, D = e1_emb.shape
    n_pad, D2 = ew_padded.shape
    assert D == D2 and n_pad % tn_eff == 0

    stream_dtype = ew_padded.dtype
    # Interaction hoisted out of the sequential entity grid (computed once per
    # call, not once per grid step); bf16 so both MXU operands stream 2 B/elem.
    h = (e1_emb * rel_emb).astype(stream_dtype)          # (B, D)

    grid = (n_pad // tn_eff,)

    itemsize = jnp.dtype(stream_dtype).itemsize
    out_itemsize = jnp.dtype(out_dtype).itemsize
    cost = pl.CostEstimate(
        flops=2 * B * D * n_pad,
        transcendentals=B * n_pad,
        bytes_accessed=(n_pad * D * itemsize + B * D * itemsize
                        + B * n_pad * out_itemsize))

    # VMEM: double-buffered table tile + double-buffered output tile + h.
    vmem_bytes = (2 * tn_eff * D * itemsize
                  + 2 * B * tn_eff * out_itemsize
                  + B * D * itemsize)
    # TODO(synk): for training-style large B, add a B-tile grid axis and
    # re-derive this budget against v7x's 64 MiB VMEM.
    extra = {}
    if vmem_bytes > (12 << 20):  # above v5e's 16 MiB scoped default -> raise it
        extra["vmem_limit_bytes"] = int(min(vmem_bytes + (8 << 20), 64 << 20))

    def run(entity_sem):
        return pl.pallas_call(
            distmult_kernel,
            out_shape=jax.ShapeDtypeStruct((B, n_pad), out_dtype),
            grid_spec=pltpu.PrefetchScalarGridSpec(
                num_scalar_prefetch=0,
                grid=grid,
                in_specs=[
                    pl.BlockSpec((B, D), lambda j: (0, 0)),       # resident h
                    pl.BlockSpec((tn_eff, D), lambda j: (j, 0)),  # table tile
                ],
                out_specs=pl.BlockSpec((B, tn_eff), lambda j: (0, j)),
            ),
            compiler_params=pltpu.CompilerParams(
                dimension_semantics=(entity_sem,), **extra),
            cost_estimate=cost,
        )(h, ew_padded)

    if _ENTITY_AXIS_SEM is None:
        try:
            # v7x: split the table stream across both TensorCores.
            out = jax.block_until_ready(run(pltpu.CORE_PARALLEL))
            _ENTITY_AXIS_SEM = pltpu.CORE_PARALLEL
        except Exception:
            # 1-TC chips / backends without core-parallel lowering.
            _ENTITY_AXIS_SEM = pltpu.PARALLEL
            out = run(pltpu.PARALLEL)
    else:
        out = run(_ENTITY_AXIS_SEM)

    # Padded entity columns score sigmoid(0)=0.5; slice them off here (cheap at
    # small B).  Large-B consumers that keep the padded buffer must mask them.
    return out[:, :num_entities] if n_pad != num_entities else out


def distmult_reference(e1_emb, rel_emb, emb_e_weight, stream_dtype=jnp.bfloat16):
    # Mirrors the kernel's bf16 streaming + f32 accumulation.
    h = (e1_emb * rel_emb).astype(stream_dtype).astype(jnp.float32)
    ew = emb_e_weight.astype(stream_dtype).astype(jnp.float32)
    return jax.nn.sigmoid(h @ ew.T)


if __name__ == "__main__":
    # Small, DistMult-consistent shapes (non-multiple entity count exercises
    # the tail-padding path).
    num_entities = 300
    num_relations = 32
    embedding_dim = 128
    batch = 8

    key = jax.random.PRNGKey(0)
    k_e, k_r, k_i1, k_i2 = jax.random.split(key, 4)

    # Deterministic embedding tables; padding_idx=0 rows zeroed.
    emb_e = jax.random.normal(k_e, (num_entities, embedding_dim), jnp.float32)
    emb_e = emb_e.at[0].set(0.0)
    emb_rel = jax.random.normal(k_r, (num_relations, embedding_dim), jnp.float32)
    emb_rel = emb_rel.at[0].set(0.0)

    # Index inputs e1, rel of shape (batch, 1), as in the ConvE-family loaders.
    e1 = jax.random.randint(k_i1, (batch, 1), 0, num_entities, jnp.int32)
    rel = jax.random.randint(k_i2, (batch, 1), 0, num_relations, jnp.int32)

    # Embedding lookup + squeeze (plain-JAX glue, as in the PyTorch module).
    e1_embedded = jnp.take(emb_e, e1[:, 0], axis=0)      # (B, D)
    rel_embedded = jnp.take(emb_rel, rel[:, 0], axis=0)  # (B, D)
    # TODO(synk): input dropout (self.inp_drop) is identity in eval mode; omitted.

    # "Model init": cache the streaming-form (bf16, padded) entity table once.
    ew_padded, tn_eff = prepare_entity_table(emb_e)
    ew_padded = jax.block_until_ready(ew_padded)

    pred = distmult_forward(e1_embedded, rel_embedded, ew_padded,
                            num_entities, tn_eff)
    pred = jax.block_until_ready(pred)

    ref = distmult_reference(e1_embedded, rel_embedded, emb_e)
    assert pred.shape == (batch, num_entities)
    assert jnp.allclose(pred, ref, atol=1e-4, rtol=1e-4)

    print("KERNEL_OK")
</pallas_src>

<mosaic_0001>
module attributes {stable_mosaic.version = 11 : i64} {
  func.func @distmult_kernel(%arg0: i32, %arg1: memref<8x128xbf16, #tpu.memory_space<vmem>>, %arg2: memref<512x128xbf16, #tpu.memory_space<vmem>>, %arg3: memref<8x512xf32, #tpu.memory_space<vmem>>) attributes {dimension_semantics = [#tpu.dimension_semantics<core_parallel>], iteration_bounds = array<i64: 1>, scalar_prefetch = 0 : i64, scratch_operands = 0 : i64, tpu.core_type = #tpu.core_type<tc>, window_params = [{pipeline_mode = #tpu.pipeline_mode<synchronous>, transform_indices = @transform_0, window_bounds = array<i64: 8, 128>}, {transform_indices = @transform_1, window_bounds = array<i64: 512, 128>}, {transform_indices = @transform_2, window_bounds = array<i64: 8, 512>}]} {
    %c0 = arith.constant 0 : index
    %c0_0 = arith.constant 0 : index
    %0 = vector.load %arg1[%c0, %c0_0] : memref<8x128xbf16, #tpu.memory_space<vmem>>, vector<8x128xbf16>
    %c0_1 = arith.constant 0 : index
    %c0_2 = arith.constant 0 : index
    %1 = vector.load %arg2[%c0_1, %c0_2] : memref<512x128xbf16, #tpu.memory_space<vmem>>, vector<512x128xbf16>
    %cst = arith.constant dense<0.000000e+00> : vector<8x512xf32>
    %2 = tpu.matmul %0, %1, %cst {dimension_numbers = #tpu.dot_dimension_numbers<[1], [1], [0], [0], [0, 0, 1, 0], [], []>} : vector<8x128xbf16>, vector<512x128xbf16>, vector<8x512xf32> -> vector<8x512xf32>
    %3 = arith.negf %2 : vector<8x512xf32>
    %4 = math.exp %3 : vector<8x512xf32>
    %cst_3 = arith.constant 1.000000e+00 : f32
    %5 = vector.broadcast %cst_3 : f32 to vector<8x512xf32>
    %6 = arith.addf %5, %4 : vector<8x512xf32>
    %7 = arith.divf %5, %6 : vector<8x512xf32>
    %c0_4 = arith.constant 0 : index
    %c0_5 = arith.constant 0 : index
    %8 = vector.load %arg3[%c0_4, %c0_5] : memref<8x512xf32, #tpu.memory_space<vmem>>, vector<8x512xf32>
    tpu.vector_store %arg3[%c0_4, %c0_5], %7 {strides = array<i32>} : memref<8x512xf32, #tpu.memory_space<vmem>>, vector<8x512xf32>,
    return
  }
  func.func @transform_0(%arg0: i32) -> (i32, i32) {
    %c0_i32 = arith.constant 0 : i32
    %c0_i32_0 = arith.constant 0 : i32
    %c0_i32_1 = arith.constant 0 : i32
    return %c0_i32, %c0_i32_0 : i32, i32
  }
  func.func @transform_1(%arg0: i32) -> (i32, i32) {
    %c0_i32 = arith.constant 0 : i32
    %c0_i32_0 = arith.constant 0 : i32
    return %arg0, %c0_i32 : i32, i32
  }
  func.func @transform_2(%arg0: i32) -> (i32, i32) {
    %c0_i32 = arith.constant 0 : i32
    %c0_i32_0 = arith.constant 0 : i32
    return %c0_i32, %arg0 : i32, i32
  }
}

module attributes {stable_mosaic.version = 11 : i64} {
  func.func @distmult_kernel(%arg0: i32, %arg1: memref<8x128xbf16, #tpu.memory_space<vmem>>, %arg2: memref<512x128xbf16, #tpu.memory_space<vmem>>, %arg3: memref<8x512xf32, #tpu.memory_space<vmem>>) attributes {dimension_semantics = [#tpu.dimension_semantics<parallel>], iteration_bounds = array<i64: 1>, scalar_prefetch = 0 : i64, scratch_operands = 0 : i64, tpu.core_type = #tpu.core_type<tc>, window_params = [{pipeline_mode = #tpu.pipeline_mode<synchronous>, transform_indices = @transform_0, window_bounds = array<i64: 8, 128>}, {transform_indices = @transform_1, window_bounds = array<i64: 512, 128>}, {transform_indices = @transform_2, window_bounds = array<i64: 8, 512>}]} {
    %c0 = arith.constant 0 : index
    %c0_0 = arith.constant 0 : index
    %0 = vector.load %arg1[%c0, %c0_0] : memref<8x128xbf16, #tpu.memory_space<vmem>>, vector<8x128xbf16>
    %c0_1 = arith.constant 0 : index
    %c0_2 = arith.constant 0 : index
    %1 = vector.load %arg2[%c0_1, %c0_2] : memref<512x128xbf16, #tpu.memory_space<vmem>>, vector<512x128xbf16>
    %cst = arith.constant dense<0.000000e+00> : vector<8x512xf32>
    %2 = tpu.matmul %0, %1, %cst {dimension_numbers = #tpu.dot_dimension_numbers<[1], [1], [0], [0], [0, 0, 1, 0], [], []>} : vector<8x128xbf16>, vector<512x128xbf16>, vector<8x512xf32> -> vector<8x512xf32>
    %3 = arith.negf %2 : vector<8x512xf32>
    %4 = math.exp %3 : vector<8x512xf32>
    %cst_3 = arith.constant 1.000000e+00 : f32
    %5 = vector.broadcast %cst_3 : f32 to vector<8x512xf32>
    %6 = arith.addf %5, %4 : vector<8x512xf32>
    %7 = arith.divf %5, %6 : vector<8x512xf32>
    %c0_4 = arith.constant 0 : index
    %c0_5 = arith.constant 0 : index
    %8 = vector.load %arg3[%c0_4, %c0_5] : memref<8x512xf32, #tpu.memory_space<vmem>>, vector<8x512xf32>
    tpu.vector_store %arg3[%c0_4, %c0_5], %7 {strides = array<i32>} : memref<8x512xf32, #tpu.memory_space<vmem>>, vector<8x512xf32>,
    return
  }
  func.func @transform_0(%arg0: i32) -> (i32, i32) {
    %c0_i32 = arith.constant 0 : i32
    %c0_i32_0 = arith.constant 0 : i32
    %c0_i32_1 = arith.constant 0 : i32
    return %c0_i32, %c0_i32_0 : i32, i32
  }
  func.func @transform_1(%arg0: i32) -> (i32, i32) {
    %c0_i32 = arith.constant 0 : i32
    %c0_i32_0 = arith.constant 0 : i32
    return %arg0, %c0_i32 : i32, i32
  }
  func.func @transform_2(%arg0: i32) -> (i32, i32) {
    %c0_i32 = arith.constant 0 : i32
    %c0_i32_0 = arith.constant 0 : i32
    return %c0_i32, %arg0 : i32, i32
  }
}

</mosaic_0001>

<bundles_post_ra>
// kernel: tpu_custom_call.1
= control target key start
LH: loop header
LB: loop body
LE: loop exit
PB: predicated region body
PF: predicated region fallthrough
CT: control target
= control target key end

     0   :  { %s661_s9 = sld [smem:[#allocation0]]   ;;  %s702_s0 = inlined_call_operand.hbm [shape: bf16[8,128], index: 0, kind: input, shape index: {}]   ;;  %s703_s1 = inlined_call_operand.hbm [shape: bf16[512,128], index: 1, kind: input, shape index: {}]   ;;  %s704_s2 = inlined_call_operand.hbm [shape: f32[8,512], index: 2, kind: output, shape index: {}]  }
   0x1   :  { %7 = vsyncpa [#allocation3], 0 }
   0x2   :  { %8 = vsyncpa [#allocation6], 0 }
   0x3   :  { %9 = vsyncpa [#allocation4], 0  ;;  %s641_s11 = smov [#allocation2]   ;;  %s565_s18 = scalar_lea.hbm %s702_s0, 64 }
   0x4   :  { %s16_s12 = sshll.u32 %s641_s11, 4  ;;  %p566_p0 = scmp.ne.s32.totalorder %s702_s0, %s565_s18  ;;  %s17_s12 = int_to_ptr.vmem [resolvable:$true] %s16_s12 }
   0x5   :  { %p569_p1 = scmp.lt.u32.totalorder %s565_s18, %s702_s0 }
   0x6   :  { %s474_s10 = sshll.u32 %s661_s9, 12 }
   0x7   :  { %s667_s15 = scalar_lea.hbm %s703_s1, %s474_s10  ;;  %p571_p2 = pnand %p569_p1, %p566_p0 }
   0x9   :  { %574 = shalt.err (!%p571_p2)
}
   0xa   :  { %s575_s23 = scalar_lea.vmem %s17_s12, 64  ;;  %p580_p4 = scmp.lt.s32.totalorder %s17_s12, %s17_s12 }
   0xb   :  { %p576_p3 = scmp.ne.s32.totalorder %s17_s12, %s575_s23  ;;  %p581_p5 = scmp.lt.s32.totalorder %s575_s23, %s575_s23 }
   0xd   :  { %p582_p6 = por %p581_p5, %p580_p4 }
   0xf   :  { %p583_p7 = pnand %p582_p6, %p576_p3 }
  0x11   :  { %586 = shalt.err (!%p583_p7)
}
  0x12   :  { %19 = dma.hbm_to_vmem [thread:$0]  %s702_s0, 64, %s17_s12, [#allocation3]  }
  0x13   :  { %s642_s26 = smov [#allocation5]   ;;  %s587_s28 = scalar_lea.hbm %s667_s15, 4096 }
  0x14   :  { %s28_s27 = sshll.u32 %s642_s26, 4  ;;  %p588_p8 = scmp.ne.s32.totalorder %s667_s15, %s587_s28  ;;  %s29_s27 = int_to_ptr.vmem [resolvable:$true] %s28_s27 }
  0x15   :  { %s589_s3 = scalar_lea.hbm %s703_s1, 4096  ;;  %p590_p9 = scmp.lt.u32.totalorder %s667_s15, %s703_s1 }
  0x16   :  { %p591_p10 = scmp.lt.u32.totalorder %s589_s3, %s587_s28  ;;  %p593_p12 = scmp.lt.u32.totalorder %s587_s28, %s667_s15 }
  0x18   :  { %p592_p11 = por %p591_p10, %p590_p9 }
  0x1a   :  { %p594_p13 = por %p593_p12, %p592_p11 }
  0x1c   :  { %p595_p0 = pnand %p594_p13, %p588_p8 }
  0x1e   :  { %598 = shalt.err (!%p595_p0)
}
  0x1f   :  { %s599_s0 = scalar_lea.vmem %s29_s27, 4096  ;;  %p604_p2 = scmp.lt.s32.totalorder %s29_s27, %s29_s27 }
  0x20   :  { %p600_p1 = scmp.ne.s32.totalorder %s29_s27, %s599_s0  ;;  %p605_p3 = scmp.lt.s32.totalorder %s599_s0, %s599_s0 }
  0x22   :  { %p606_p4 = por %p605_p3, %p604_p2 }
  0x24   :  { %p607_p5 = pnand %p606_p4, %p600_p1 }
  0x26   :  { %610 = shalt.err (!%p607_p5)
}
  0x27   :  { %s643_s6 = smov 64   ;;  %s644_s7 = smov 4  }
  0x28   :  { %34 = dma.hbm_to_vmem [thread:$0]  %s667_s15, 4096, %s29_s27, [#allocation6], %s643_s6, %s643_s6, %s644_s7  }
  0x29   :  { %635 = dma.done.wait [#allocation3], 64  }
  0x2a   :  { %636 = vsyncadd [#allocation3], 4294967232 }
  0x2b   :  { %637 = dma.done.wait [#allocation6], 4096  }
  0x2c   :  { %638 = vsyncadd [#allocation6], 4294963200  ;;  %v517_v0 = vld [vmem:[#allocation5 + $0x40] sm:$0xff]   ;;  %v521_v4 = vld [vmem:[#allocation5 + $0x48] sm:$0xff]   ;;  %s475_s1 = sshll.u32 %s661_s9, 9  ;;  %s645_s8 = smov [#allocation7]  }
  0x2d   :  { %v518_v1 = vld [vmem:[#allocation5 + $0xc0] sm:$0xff]   ;;  %476 = vmatprep.subr.bf16.mxu0 %v517_v0  ;;  %v522_v5 = vld [vmem:[#allocation5 + $0xc8] sm:$0xff]   ;;  %v525_v8 = vld [vmem:[#allocation5 + $0x50] sm:$0xff]   ;;  %s420_s10 = sshll.u32 %s645_s8, 4  ;;  %s418_s13 = scalar_lea.hbm %s704_s2, %s475_s1  ;;  %s421_s10 = int_to_ptr.vmem [resolvable:$true] %s420_s10 }
  0x2e   :  { %v519_v2 = vld [vmem:[#allocation5] sm:$0xff]   ;;  %494 = vmatprep.subr.bf16.mxu1 %v518_v1  ;;  %v523_v6 = vld [vmem:[#allocation5 + $0x8] sm:$0xff]   ;;  %v526_v9 = vld [vmem:[#allocation5 + $0xd0] sm:$0xff]   ;;  %s611_s14 = scalar_lea.vmem %s421_s10, 512  ;;  %p616_p7 = scmp.lt.s32.totalorder %s421_s10, %s421_s10 }
  0x2f   :  { %v520_v3 = vld [vmem:[#allocation5 + $0x80] sm:$0xff]   ;;  %477 = vmatpush3.bf16.xpose.msra.mxu0 %v519_v2  ;;  %v524_v7 = vld [vmem:[#allocation5 + $0x88] sm:$0xff]   ;;  %v527_v10 = vld [vmem:[#allocation5 + $0x10] sm:$0xff]   ;;  %p612_p6 = scmp.ne.s32.totalorder %s421_s10, %s611_s14  ;;  %p617_p8 = scmp.lt.s32.totalorder %s611_s14, %s611_s14 }
  0x30   :  { %495 = vmatpush3.bf16.xpose.msra.mxu1 %v520_v3  ;;  %478 = vmatprep.subr.bf16.mxu0 %v521_v4  ;;  %v528_v11 = vld [vmem:[#allocation5 + $0x90] sm:$0xff]   ;;  %v529_v12 = vld [vmem:[#allocation5 + $0x58] sm:$0xff]   ;;  %v533_v16 = vld [vmem:[#allocation5 + $0x60] sm:$0xff]  }
  0x31   :  { %496 = vmatprep.subr.bf16.mxu1 %v522_v5  ;;  %v530_v13 = vld [vmem:[#allocation5 + $0xd8] sm:$0xff]   ;;  %v534_v17 = vld [vmem:[#allocation5 + $0xe0] sm:$0xff]   ;;  %v537_v21 = vld [vmem:[#allocation5 + $0x68] sm:$0xff]   ;;  %p618_p9 = por %p617_p8, %p616_p7 }
  0x32   :  { %v531_v14 = vld [vmem:[#allocation5 + $0x18] sm:$0xff]   ;;  %v535_v18 = vld [vmem:[#allocation5 + $0x20] sm:$0xff]   ;;  %v538_v22 = vld [vmem:[#allocation5 + $0xe8] sm:$0xff]  }
  0x33   :  { %v532_v15 = vld [vmem:[#allocation5 + $0x98] sm:$0xff]   ;;  %v536_v20 = vld [vmem:[#allocation5 + $0xa0] sm:$0xff]   ;;  %v539_v23 = vld [vmem:[#allocation5 + $0x28] sm:$0xff]   ;;  %p619_p10 = pnand %p618_p9, %p612_p6 }
  0x34   :  { %v44_v19 = vld [vmem:[#allocation2] sm:$0xf]  ;;  %v540_v24 = vld [vmem:[#allocation5 + $0xa8] sm:$0xff]   ;;  %v541_v25 = vld [vmem:[#allocation5 + $0x70] sm:$0xff]  }
  0x35   :  { %492 = vmatprep.mubr.bf16.mxu0 %v44_v19  ;;  %510 = vmatprep.mubr.bf16.mxu1 %v44_v19  ;;  %v542_v26 = vld [vmem:[#allocation5 + $0xf0] sm:$0xff]   ;;  %v545_v29 = vld [vmem:[#allocation5 + $0x78] sm:$0xff]  }
  0x36   :  { %v543_v27 = vld [vmem:[#allocation5 + $0x30] sm:$0xff]   ;;  %v546_v30 = vld [vmem:[#allocation5 + $0xf8] sm:$0xff]  }
  0x37   :  { %479 = vmatpush3.bf16.xpose.msra.mxu0 %v523_v6  ;;  %v544_v28 = vld [vmem:[#allocation5 + $0xb0] sm:$0xff]   ;;  %v547_v31 = vld [vmem:[#allocation5 + $0x38] sm:$0xff]  }
  0x38   :  { %497 = vmatpush3.bf16.xpose.msra.mxu1 %v524_v7  ;;  %480 = vmatprep.subr.bf16.mxu0 %v525_v8  ;;  %v548_v32 = vld [vmem:[#allocation5 + $0xb8] sm:$0xff]  }
  0x39   :  { %498 = vmatprep.subr.bf16.mxu1 %v526_v9 }
  0x3f   :  { %481 = vmatpush3.bf16.xpose.msra.mxu0 %v527_v10 }
  0x40   :  { %499 = vmatpush3.bf16.xpose.msra.mxu1 %v528_v11  ;;  %482 = vmatprep.subr.bf16.mxu0 %v529_v12 }
  0x41   :  { %500 = vmatprep.subr.bf16.mxu1 %v530_v13 }
  0x47   :  { %483 = vmatpush3.bf16.xpose.msra.mxu0 %v531_v14 }
  0x48   :  { %501 = vmatpush3.bf16.xpose.msra.mxu1 %v532_v15  ;;  %484 = vmatprep.subr.bf16.mxu0 %v533_v16 }
  0x49   :  { %502 = vmatprep.subr.bf16.mxu1 %v534_v17 }
  0x4f   :  { %485 = vmatpush3.bf16.xpose.msra.mxu0 %v535_v18 }
  0x50   :  { %503 = vmatpush3.bf16.xpose.msra.mxu1 %v536_v20  ;;  %486 = vmatprep.subr.bf16.mxu0 %v537_v21 }
  0x51   :  { %504 = vmatprep.subr.bf16.mxu1 %v538_v22 }
  0x57   :  { %487 = vmatpush3.bf16.xpose.msra.mxu0 %v539_v23 }
  0x58   :  { %505 = vmatpush3.bf16.xpose.msra.mxu1 %v540_v24  ;;  %488 = vmatprep.subr.bf16.mxu0 %v541_v25 }
  0x59   :  { %506 = vmatprep.subr.bf16.mxu1 %v542_v26 }
  0x5f   :  { %489 = vmatpush3.bf16.xpose.msra.mxu0 %v543_v27 }
  0x60   :  { %507 = vmatpush3.bf16.xpose.msra.mxu1 %v544_v28  ;;  %490 = vmatprep.subr.bf16.mxu0 %v545_v29 }
  0x61   :  { %508 = vmatprep.subr.bf16.mxu1 %v546_v30 }
  0x67   :  { %491 = vmatpush3.bf16.xpose.msra.mxu0 %v547_v31 }
  0x68   :  { %509 = vmatpush3.bf16.xpose.msra.mxu1 %v548_v32 }
  0x6e   :  { %493 = vmatmul.mubr.bf16.vlgmr.msra.gmra.mrb[0].mxu0 %v44_v19 }
  0x6f   :  { %511 = vmatmul.mubr.bf16.vlgmr.msra.gmra.mrb[0].mxu1 %v44_v19 }
 0x141   :  { %v335_v33 = vpop.f32.mrb[0].mxu0 }
 0x142   :  { %v468_v34 = vmul.f32 -1.442695, %v335_v33  ;;  %v376_v35 = vpop.f32.mrb[0].mxu1  ;;  %v337_v36 = vpop.f32.mrb[1].mxu0 }
 0x143   :  { %v470_v37 = vmul.f32 -1.442695, %v376_v35  ;;  %v469_v38 = vmul.f32 -1.442695, %v337_v36  ;;  %v378_v39 = vpop.f32.mrb[1].mxu1  ;;  %v339_v40 = vpop.f32.mrb[2].mxu0 }
 0x144   :  { %549 = vpow2.f32 %v468_v34  ;;  %v471_v41 = vmul.f32 -1.442695, %v378_v39  ;;  %v380_v42 = vpop.f32.mrb[2].mxu1  ;;  %v340_v43 = vpop.f32.mrb[3].mxu0 }
 0x145   :  { %551 = vpow2.f32 %v470_v37  ;;  %v381_v44 = vpop.f32.mrb[3].mxu1 }
 0x146   :  { %553 = vpow2.f32 %v469_v38 }
 0x147   :  { %555 = vpow2.f32 %v471_v41 }
 0x14e   :  { %v550_v45 = vpop.eup %549 }
 0x14f   :  { %v552_v46 = vpop.eup %551  ;;  %v395_v47 = vadd.f32 1.0, %v550_v45 }
 0x150   :  { %v554_v48 = vpop.eup %553  ;;  %v397_v49 = vadd.f32 1.0, %v552_v46 }
 0x151   :  { %v556_v50 = vpop.eup %555  ;;  %557 = vrcp.f32 %v395_v47  ;;  %v396_v51 = vadd.f32 1.0, %v554_v48 }
 0x152   :  { %559 = vrcp.f32 %v397_v49  ;;  %v398_v52 = vadd.f32 1.0, %v556_v50 }
 0x153   :  { %561 = vrcp.f32 %v396_v51 }
 0x154   :  { %563 = vrcp.f32 %v398_v52 }
 0x15b   :  { %v558_v53 = vpop.eup %557 }
 0x15c   :  { %v560_v54 = vpop.eup %559  ;;  %407 = vst [vmem:[#allocation7] sm:$0xff] %v558_v53 }
 0x15d   :  { %v562_v55 = vpop.eup %561  ;;  %409 = vst [vmem:[#allocation7 + $0x10] sm:$0xff] %v560_v54 }
 0x15e   :  { %v564_v56 = vpop.eup %563  ;;  %408 = vst [vmem:[#allocation7 + $0x8] sm:$0xff] %v562_v55 }
 0x15f   :  { %410 = vst [vmem:[#allocation7 + $0x18] sm:$0xff] %v564_v56 }
 0x160   :  { %622 = shalt.err (!%p619_p10)
}
 0x161   :  { %s623_s9 = scalar_lea.hbm %s418_s13, 512  ;;  %s625_s17 = scalar_lea.hbm %s704_s2, 512 }
 0x162   :  { %p624_p11 = scmp.ne.s32.totalorder %s418_s13, %s623_s9  ;;  %p626_p12 = scmp.lt.u32.totalorder %s418_s13, %s704_s2 }
 0x163   :  { %p627_p13 = scmp.lt.u32.totalorder %s625_s17, %s623_s9  ;;  %p629_p1 = scmp.lt.u32.totalorder %s623_s9, %s418_s13 }
 0x165   :  { %p628_p0 = por %p627_p13, %p626_p12 }
 0x167   :  { %p630_p2 = por %p629_p1, %p628_p0 }
 0x169   :  { %p631_p3 = pnand %p630_p2, %p624_p11 }
 0x16b   :  { %634 = shalt.err (!%p631_p3)
}
 0x16c   :  { %423 = dma.vmem_to_hbm [thread:$0]  %s421_s10, 512, %s418_s13, [#allocation4]  }
 0x16d   :  { %639 = dma.done.wait [#allocation4], 512  }
 0x16e   :  { %640 = vsyncadd [#allocation4], 4294966784 }
 0x16f   :  { %427 = vsyncpa [#allocation3], 1 }
 0x170   :  { %428 = vsyncpa [#allocation6], 1 }
 0x171   :  { %429 = vsyncpa [#allocation4], 1 }

// kernel: tpu_custom_call.1
= control target key start
LH: loop header
LB: loop body
LE: loop exit
PB: predicated region body
PF: predicated region fallthrough
CT: control target
= control target key end

     0   :  { %7 = vsyncpa [#allocation3], 0  ;;  %s682_s0 = inlined_call_operand.hbm [shape: bf16[8,128], index: 0, kind: input, shape index: {}]   ;;  %s683_s1 = inlined_call_operand.hbm [shape: bf16[512,128], index: 1, kind: input, shape index: {}]   ;;  %s684_s2 = inlined_call_operand.hbm [shape: f32[8,512], index: 2, kind: output, shape index: {}]  }
   0x1   :  { %8 = vsyncpa [#allocation6], 0 }
   0x2   :  { %9 = vsyncpa [#allocation4], 0  ;;  %s619_s9 = smov [#allocation2]   ;;  %s620_s11 = smov [#allocation5]  }
   0x3   :  { %s16_s10 = sshll.u32 %s619_s9, 4  ;;  %s25_s12 = sshll.u32 %s620_s11, 4  ;;  %s17_s10 = int_to_ptr.vmem [resolvable:$true] %s16_s10  ;;  %s639_s12 = int_to_ptr.vmem [resolvable:$true] %s25_s12 }
   0x4   :  { %s547_s15 = scalar_lea.hbm %s682_s0, 64 }
   0x5   :  { %p548_p0 = scmp.ne.s32.totalorder %s682_s0, %s547_s15  ;;  %p551_p1 = scmp.lt.u32.totalorder %s547_s15, %s682_s0 }
   0x7   :  { %p553_p2 = pnand %p551_p1, %p548_p0 }
   0x9   :  { %556 = shalt.err (!%p553_p2)
}
   0xa   :  { %s557_s20 = scalar_lea.vmem %s17_s10, 64  ;;  %p562_p4 = scmp.lt.s32.totalorder %s17_s10, %s17_s10 }
   0xb   :  { %p558_p3 = scmp.ne.s32.totalorder %s17_s10, %s557_s20  ;;  %p563_p5 = scmp.lt.s32.totalorder %s557_s20, %s557_s20 }
   0xd   :  { %p564_p6 = por %p563_p5, %p562_p4 }
   0xf   :  { %p565_p7 = pnand %p564_p6, %p558_p3 }
  0x11   :  { %568 = shalt.err (!%p565_p7)
}
  0x12   :  { %19 = dma.hbm_to_vmem [thread:$0]  %s682_s0, 64, %s17_s10, [#allocation3]  }
  0x13   :  { %s569_s25 = scalar_lea.hbm %s683_s1, 4096 }
  0x14   :  { %p570_p8 = scmp.ne.s32.totalorder %s683_s1, %s569_s25  ;;  %p573_p9 = scmp.lt.u32.totalorder %s569_s25, %s683_s1 }
  0x16   :  { %p575_p10 = pnand %p573_p9, %p570_p8 }
  0x18   :  { %578 = shalt.err (!%p575_p10)
}
  0x19   :  { %s579_s30 = scalar_lea.vmem %s639_s12, 4096  ;;  %p584_p12 = scmp.lt.s32.totalorder %s639_s12, %s639_s12 }
  0x1a   :  { %p580_p11 = scmp.ne.s32.totalorder %s639_s12, %s579_s30  ;;  %p585_p13 = scmp.lt.s32.totalorder %s579_s30, %s579_s30 }
  0x1c   :  { %p586_p0 = por %p585_p13, %p584_p12 }
  0x1e   :  { %p587_p1 = pnand %p586_p0, %p580_p11 }
  0x20   :  { %590 = shalt.err (!%p587_p1)
}
  0x21   :  { %s621_s0 = smov 64   ;;  %s622_s3 = smov 4  }
  0x22   :  { %31 = dma.hbm_to_vmem [thread:$0]  %s683_s1, 4096, %s639_s12, [#allocation6], %s621_s0, %s621_s0, %s622_s3  }
  0x23   :  { %613 = dma.done.wait [#allocation3], 64  }
  0x24   :  { %614 = vsyncadd [#allocation3], 4294967232 }
  0x25   :  { %615 = dma.done.wait [#allocation6], 4096  }
  0x26   :  { %616 = vsyncadd [#allocation6], 4294963200  ;;  %v499_v0 = vld [vmem:[#allocation5 + $0x40] sm:$0xff]   ;;  %v503_v4 = vld [vmem:[#allocation5 + $0x48] sm:$0xff]   ;;  %s623_s1 = smov [#allocation7]  }
  0x27   :  { %v500_v1 = vld [vmem:[#allocation5 + $0xc0] sm:$0xff]   ;;  %458 = vmatprep.subr.bf16.mxu0 %v499_v0  ;;  %v504_v5 = vld [vmem:[#allocation5 + $0xc8] sm:$0xff]   ;;  %v507_v8 = vld [vmem:[#allocation5 + $0x50] sm:$0xff]   ;;  %s412_s6 = sshll.u32 %s623_s1, 4  ;;  %s413_s6 = int_to_ptr.vmem [resolvable:$true] %s412_s6 }
  0x28   :  { %v501_v2 = vld [vmem:[#allocation5] sm:$0xff]   ;;  %476 = vmatprep.subr.bf16.mxu1 %v500_v1  ;;  %v505_v6 = vld [vmem:[#allocation5 + $0x8] sm:$0xff]   ;;  %v508_v9 = vld [vmem:[#allocation5 + $0xd0] sm:$0xff]   ;;  %s591_s7 = scalar_lea.vmem %s413_s6, 512  ;;  %p596_p3 = scmp.lt.s32.totalorder %s413_s6, %s413_s6 }
  0x29   :  { %v502_v3 = vld [vmem:[#allocation5 + $0x80] sm:$0xff]   ;;  %459 = vmatpush3.bf16.xpose.msra.mxu0 %v501_v2  ;;  %v506_v7 = vld [vmem:[#allocation5 + $0x88] sm:$0xff]   ;;  %v509_v10 = vld [vmem:[#allocation5 + $0x10] sm:$0xff]   ;;  %p592_p2 = scmp.ne.s32.totalorder %s413_s6, %s591_s7  ;;  %p597_p4 = scmp.lt.s32.totalorder %s591_s7, %s591_s7 }
  0x2a   :  { %477 = vmatpush3.bf16.xpose.msra.mxu1 %v502_v3  ;;  %460 = vmatprep.subr.bf16.mxu0 %v503_v4  ;;  %v510_v11 = vld [vmem:[#allocation5 + $0x90] sm:$0xff]   ;;  %v511_v12 = vld [vmem:[#allocation5 + $0x58] sm:$0xff]   ;;  %v515_v16 = vld [vmem:[#allocation5 + $0x60] sm:$0xff]  }
  0x2b   :  { %478 = vmatprep.subr.bf16.mxu1 %v504_v5  ;;  %v512_v13 = vld [vmem:[#allocation5 + $0xd8] sm:$0xff]   ;;  %v516_v17 = vld [vmem:[#allocation5 + $0xe0] sm:$0xff]   ;;  %v519_v21 = vld [vmem:[#allocation5 + $0x68] sm:$0xff]   ;;  %p598_p5 = por %p597_p4, %p596_p3 }
  0x2c   :  { %v513_v14 = vld [vmem:[#allocation5 + $0x18] sm:$0xff]   ;;  %v517_v18 = vld [vmem:[#allocation5 + $0x20] sm:$0xff]   ;;  %v520_v22 = vld [vmem:[#allocation5 + $0xe8] sm:$0xff]  }
  0x2d   :  { %v514_v15 = vld [vmem:[#allocation5 + $0x98] sm:$0xff]   ;;  %v518_v20 = vld [vmem:[#allocation5 + $0xa0] sm:$0xff]   ;;  %v521_v23 = vld [vmem:[#allocation5 + $0x28] sm:$0xff]   ;;  %p599_p6 = pnand %p598_p5, %p592_p2 }
  0x2e   :  { %v39_v19 = vld [vmem:[#allocation2] sm:$0xf]  ;;  %v522_v24 = vld [vmem:[#allocation5 + $0xa8] sm:$0xff]   ;;  %v523_v25 = vld [vmem:[#allocation5 + $0x70] sm:$0xff]  }
  0x2f   :  { %474 = vmatprep.mubr.bf16.mxu0 %v39_v19  ;;  %492 = vmatprep.mubr.bf16.mxu1 %v39_v19  ;;  %v524_v26 = vld [vmem:[#allocation5 + $0xf0] sm:$0xff]   ;;  %v527_v29 = vld [vmem:[#allocation5 + $0x78] sm:$0xff]  }
  0x30   :  { %v525_v27 = vld [vmem:[#allocation5 + $0x30] sm:$0xff]   ;;  %v528_v30 = vld [vmem:[#allocation5 + $0xf8] sm:$0xff]  }
  0x31   :  { %461 = vmatpush3.bf16.xpose.msra.mxu0 %v505_v6  ;;  %v526_v28 = vld [vmem:[#allocation5 + $0xb0] sm:$0xff]   ;;  %v529_v31 = vld [vmem:[#allocation5 + $0x38] sm:$0xff]  }
  0x32   :  { %479 = vmatpush3.bf16.xpose.msra.mxu1 %v506_v7  ;;  %462 = vmatprep.subr.bf16.mxu0 %v507_v8  ;;  %v530_v32 = vld [vmem:[#allocation5 + $0xb8] sm:$0xff]  }
  0x33   :  { %480 = vmatprep.subr.bf16.mxu1 %v508_v9 }
  0x39   :  { %463 = vmatpush3.bf16.xpose.msra.mxu0 %v509_v10 }
  0x3a   :  { %481 = vmatpush3.bf16.xpose.msra.mxu1 %v510_v11  ;;  %464 = vmatprep.subr.bf16.mxu0 %v511_v12 }
  0x3b   :  { %482 = vmatprep.subr.bf16.mxu1 %v512_v13 }
  0x41   :  { %465 = vmatpush3.bf16.xpose.msra.mxu0 %v513_v14 }
  0x42   :  { %483 = vmatpush3.bf16.xpose.msra.mxu1 %v514_v15  ;;  %466 = vmatprep.subr.bf16.mxu0 %v515_v16 }
  0x43   :  { %484 = vmatprep.subr.bf16.mxu1 %v516_v17 }
  0x49   :  { %467 = vmatpush3.bf16.xpose.msra.mxu0 %v517_v18 }
  0x4a   :  { %485 = vmatpush3.bf16.xpose.msra.mxu1 %v518_v20  ;;  %468 = vmatprep.subr.bf16.mxu0 %v519_v21 }
  0x4b   :  { %486 = vmatprep.subr.bf16.mxu1 %v520_v22 }
  0x51   :  { %469 = vmatpush3.bf16.xpose.msra.mxu0 %v521_v23 }
  0x52   :  { %487 = vmatpush3.bf16.xpose.msra.mxu1 %v522_v24  ;;  %470 = vmatprep.subr.bf16.mxu0 %v523_v25 }
  0x53   :  { %488 = vmatprep.subr.bf16.mxu1 %v524_v26 }
  0x59   :  { %471 = vmatpush3.bf16.xpose.msra.mxu0 %v525_v27 }
  0x5a   :  { %489 = vmatpush3.bf16.xpose.msra.mxu1 %v526_v28  ;;  %472 = vmatprep.subr.bf16.mxu0 %v527_v29 }
  0x5b   :  { %490 = vmatprep.subr.bf16.mxu1 %v528_v30 }
  0x61   :  { %473 = vmatpush3.bf16.xpose.msra.mxu0 %v529_v31 }
  0x62   :  { %491 = vmatpush3.bf16.xpose.msra.mxu1 %v530_v32 }
  0x68   :  { %475 = vmatmul.mubr.bf16.vlgmr.msra.gmra.mrb[0].mxu0 %v39_v19 }
  0x69   :  { %493 = vmatmul.mubr.bf16.vlgmr.msra.gmra.mrb[0].mxu1 %v39_v19 }
 0x13b   :  { %v330_v33 = vpop.f32.mrb[0].mxu0 }
 0x13c   :  { %v454_v34 = vmul.f32 -1.442695, %v330_v33  ;;  %v371_v35 = vpop.f32.mrb[0].mxu1  ;;  %v332_v36 = vpop.f32.mrb[1].mxu0 }
 0x13d   :  { %v456_v37 = vmul.f32 -1.442695, %v371_v35  ;;  %v455_v38 = vmul.f32 -1.442695, %v332_v36  ;;  %v373_v39 = vpop.f32.mrb[1].mxu1  ;;  %v334_v40 = vpop.f32.mrb[2].mxu0 }
 0x13e   :  { %531 = vpow2.f32 %v454_v34  ;;  %v457_v41 = vmul.f32 -1.442695, %v373_v39  ;;  %v375_v42 = vpop.f32.mrb[2].mxu1  ;;  %v335_v43 = vpop.f32.mrb[3].mxu0 }
 0x13f   :  { %533 = vpow2.f32 %v456_v37  ;;  %v376_v44 = vpop.f32.mrb[3].mxu1 }
 0x140   :  { %535 = vpow2.f32 %v455_v38 }
 0x141   :  { %537 = vpow2.f32 %v457_v41 }
 0x148   :  { %v532_v45 = vpop.eup %531 }
 0x149   :  { %v534_v46 = vpop.eup %533  ;;  %v390_v47 = vadd.f32 1.0, %v532_v45 }
 0x14a   :  { %v536_v48 = vpop.eup %535  ;;  %v392_v49 = vadd.f32 1.0, %v534_v46 }
 0x14b   :  { %v538_v50 = vpop.eup %537  ;;  %539 = vrcp.f32 %v390_v47  ;;  %v391_v51 = vadd.f32 1.0, %v536_v48 }
 0x14c   :  { %541 = vrcp.f32 %v392_v49  ;;  %v393_v52 = vadd.f32 1.0, %v538_v50 }
 0x14d   :  { %543 = vrcp.f32 %v391_v51 }
 0x14e   :  { %545 = vrcp.f32 %v393_v52 }
 0x155   :  { %v540_v53 = vpop.eup %539 }
 0x156   :  { %v542_v54 = vpop.eup %541  ;;  %402 = vst [vmem:[#allocation7] sm:$0xff] %v540_v53 }
 0x157   :  { %v544_v55 = vpop.eup %543  ;;  %404 = vst [vmem:[#allocation7 + $0x10] sm:$0xff] %v542_v54 }
 0x158   :  { %v546_v56 = vpop.eup %545  ;;  %403 = vst [vmem:[#allocation7 + $0x8] sm:$0xff] %v544_v55 }
 0x159   :  { %405 = vst [vmem:[#allocation7 + $0x18] sm:$0xff] %v546_v56 }
 0x15a   :  { %602 = shalt.err (!%p599_p6)
}
 0x15b   :  { %s603_s10 = scalar_lea.hbm %s684_s2, 512 }
 0x15c   :  { %p604_p7 = scmp.ne.s32.totalorder %s684_s2, %s603_s10  ;;  %p607_p8 = scmp.lt.u32.totalorder %s603_s10, %s684_s2 }
 0x15e   :  { %p609_p9 = pnand %p607_p8, %p604_p7 }
 0x160   :  { %612 = shalt.err (!%p609_p9)
}
 0x161   :  { %415 = dma.vmem_to_hbm [thread:$0]  %s413_s6, 512, %s684_s2, [#allocation4]  }
 0x162   :  { %617 = dma.done.wait [#allocation4], 512  }
 0x163   :  { %618 = vsyncadd [#allocation4], 4294966784 }
 0x164   :  { %419 = vsyncpa [#allocation3], 1 }
 0x165   :  { %420 = vsyncpa [#allocation6], 1 }
 0x166   :  { %421 = vsyncpa [#allocation4], 1 }

</bundles_post_ra>
